<compile_context>
chip_gen: v5e
topology: v5e:2x2
jax: 0.10.0
libtpu: 0.0.40
codegen_flags: <defaults>
</compile_context>

<pallas_src>
import jax
import jax.numpy as jnp
from jax.experimental import pallas as pl
from jax.experimental.pallas import tpu as pltpu

# Module hyper-parameters (small, consistent with the reference module).
EMBEDDING_SIZE = 16
HIDDEN_SIZE = 32
OUTPUT_SIZE = 40
VOC_SIZE = 50
MAX_LENGTH = 8


def _decoder_kernel(emb_ref, h0_ref, c0_ref, henc_ref,
                    wpack_ref, w_att_v1_ref, w_v2_ref,
                    pvocab_ref, state_ref):
    H = HIDDEN_SIZE
    E = EMBEDDING_SIZE
    O = OUTPUT_SIZE
    XH = E + H                     # fused [x | h] contraction width (48)
    B0 = 2 * XH                    # first bias row inside wpack (96)

    def bias_row(r):               # full-lane (1,128) row load; value-sliced by callers
        return wpack_ref[pl.ds(B0 + r, 1), :]

    x = emb_ref[...]                                               # (1, E)

    # ---- bidirectional LSTM cell, seq_len == 1: one fused-gate matmul per dir ----
    h_new, c_new = [], []
    for d in range(2):             # Python-unrolled -> every slice below is static
        h_prev = h0_ref[pl.ds(d, 1), :]                            # (1, H)
        c_prev = c0_ref[pl.ds(d, 1), :]                            # (1, H)
        xh = jnp.concatenate([x, h_prev], axis=1)                  # (1, E+H)
        w_d = wpack_ref[pl.ds(d * XH, XH), :]                      # (E+H, 4H)
        gates = (jnp.dot(xh, w_d, preferred_element_type=jnp.float32)
                 + bias_row(d))                                    # (1, 4H)
        sg = jax.nn.sigmoid(gates)
        th = jnp.tanh(gates)
        i_g = sg[:, 0 * H:1 * H]
        f_g = sg[:, 1 * H:2 * H]
        g_g = th[:, 2 * H:3 * H]
        o_g = sg[:, 3 * H:4 * H]
        c_d = f_g * c_prev + i_g * g_g                             # (1, H)
        h_d = o_g * jnp.tanh(c_d)                                  # (1, H)
        h_new.append(h_d)
        c_new.append(c_d)

    # Single coalesced store of the packed next state: rows [h_fwd, h_bwd, c_fwd, c_bwd]
    state_ref[...] = jnp.concatenate(h_new + c_new, axis=0)        # (4, H)

    # s_t = cat(h_n[0], c_n[0])   (torch-faithful: hidden[0][0], hidden[1][0])
    s_t = jnp.concatenate([h_new[0], c_new[0]], axis=1)            # (1, 2H)

    # ---- fused additive attention: one K = 4H matmul over [h_enc | s_t] ----
    h_enc = henc_ref[...]                                          # (L, 2H)
    L = h_enc.shape[0]
    attn_in = jnp.concatenate(
        [h_enc, jnp.broadcast_to(s_t, (L, 2 * H))], axis=1)        # (L, 4H)
    w_att = w_att_v1_ref[pl.ds(0, 4 * H), :]                       # (4H, H) = [Wh.T ; Ws.T]
    b_att = bias_row(2)[:, :H]                                     # wh_b + ws_b
    t = jnp.tanh(jnp.dot(attn_in, w_att,
                         preferred_element_type=jnp.float32) + b_att)   # (L, H)

    # e_t = attn_v(t): elementwise + lane reduce (attn_v weight is a single row)
    v_w = bias_row(3)[:, :H]                                       # (1, H)
    v_b = bias_row(4)[:, :1]                                       # (1, 1)
    e = jnp.sum(t * v_w, axis=1, keepdims=True) + v_b              # (L, 1)

    # softmax over L (attention weights); approx reciprocal -> otherwise-idle EUP slot
    e_max = jnp.max(e, axis=0, keepdims=True)
    p = jnp.exp(e - e_max)
    a = p * pl.reciprocal(jnp.sum(p, axis=0, keepdims=True), approx=True)   # (L, 1)

    # hstar_t = a_t @ h_enc (done as broadcast-multiply + sublane reduce)
    hstar = jnp.sum(a * h_enc, axis=0, keepdims=True)              # (1, 2H)

    # ---- v1 = V1([s_t | hstar]); v2 = V2(v1); Pvocab = softmax(v2) ----
    v1_in = jnp.concatenate([s_t, hstar], axis=1)                  # (1, 4H)
    w_v1 = w_att_v1_ref[pl.ds(4 * H, 4 * H), :]                    # (4H, H)
    v1 = (jnp.dot(v1_in, w_v1, preferred_element_type=jnp.float32)
          + bias_row(5)[:, :H])                                    # (1, H)
    v2 = (jnp.dot(v1, w_v2_ref[...], preferred_element_type=jnp.float32)
          + bias_row(6)[:, :O])                                    # (1, O)
    v2_max = jnp.max(v2, axis=1, keepdims=True)
    ev = jnp.exp(v2 - v2_max)
    # exact divide here: keeps the probability normalization tight (1e-4 check)
    pvocab_ref[...] = ev / jnp.sum(ev, axis=1, keepdims=True)      # (1, O)


def init_params(key, emb_size=EMBEDDING_SIZE, hidden=HIDDEN_SIZE,
                out_size=OUTPUT_SIZE, voc=VOC_SIZE):
    """Deterministic synthetic parameters matching the torch module's shapes."""
    ks = jax.random.split(key, 16)
    s = 0.1
    p = {}
    p["embedding"] = s * jax.random.normal(ks[0], (voc, emb_size), jnp.float32)
    # LSTM, per direction (0 = fwd, 1 = reverse), PyTorch packing (4H, in), gates i,f,g,o.
    p["w_ih"] = s * jax.random.normal(ks[1], (2, 4 * hidden, emb_size), jnp.float32)
    p["w_hh"] = s * jax.random.normal(ks[2], (2, 4 * hidden, hidden), jnp.float32)
    p["b_ih"] = s * jax.random.normal(ks[3], (2, 4 * hidden), jnp.float32)
    p["b_hh"] = s * jax.random.normal(ks[4], (2, 4 * hidden), jnp.float32)
    # Linear layers: torch weight shape is (out, in).
    p["attn_Ws_w"] = s * jax.random.normal(ks[5], (hidden, 2 * hidden), jnp.float32)
    p["attn_Ws_b"] = s * jax.random.normal(ks[6], (hidden,), jnp.float32)
    p["attn_Wh_w"] = s * jax.random.normal(ks[7], (hidden, 2 * hidden), jnp.float32)
    p["attn_Wh_b"] = s * jax.random.normal(ks[8], (hidden,), jnp.float32)
    p["attn_v_w"] = s * jax.random.normal(ks[9], (1, hidden), jnp.float32)
    p["attn_v_b"] = s * jax.random.normal(ks[10], (1,), jnp.float32)
    p["lin_V1_w"] = s * jax.random.normal(ks[11], (hidden, 4 * hidden), jnp.float32)
    p["lin_V1_b"] = s * jax.random.normal(ks[12], (hidden,), jnp.float32)
    p["lin_V2_w"] = s * jax.random.normal(ks[13], (out_size, hidden), jnp.float32)
    p["lin_V2_b"] = s * jax.random.normal(ks[14], (out_size,), jnp.float32)
    return p


def prepare_kernel_params(params):
    """One-time repacking of torch-layout params into kernel-layout slabs.

    Runs OUTSIDE the per-step jit so no transpose/reshape work happens on the
    decode path.
    """
    H, E, O = HIDDEN_SIZE, EMBEDDING_SIZE, OUTPUT_SIZE

    # Fused LSTM gate weights: per direction (E+H, 4H), gate columns [i|f|g|o].
    w_dir = [jnp.concatenate([params["w_ih"][d].T, params["w_hh"][d].T], axis=0)
             for d in range(2)]                                    # 2 x (E+H, 4H)
    w_gates = jnp.concatenate(w_dir, axis=0)                       # (2*(E+H), 4H) = (96, 128)

    b_gates = params["b_ih"] + params["b_hh"]                      # (2, 4H)

    def row128(v):
        v = jnp.asarray(v, jnp.float32).reshape(1, -1)
        return jnp.pad(v, ((0, 0), (0, 128 - v.shape[1])))

    bias_rows = jnp.concatenate([
        row128(b_gates[0]),                                        # row 0: gate bias, dir 0
        row128(b_gates[1]),                                        # row 1: gate bias, dir 1
        row128(params["attn_Wh_b"] + params["attn_Ws_b"]),         # row 2: fused attn bias
        row128(params["attn_v_w"][0]),                             # row 3: attn_v weight row
        row128(params["attn_v_b"]),                                # row 4: attn_v bias
        row128(params["lin_V1_b"]),                                # row 5: V1 bias
        row128(params["lin_V2_b"]),                                # row 6: V2 bias
        jnp.zeros((1, 128), jnp.float32),                          # row 7: pad
    ], axis=0)                                                     # (8, 128)

    wpack = jnp.concatenate([w_gates, bias_rows], axis=0)          # (104, 128)

    # Attention projection [Wh.T ; Ws.T] stacked with V1.T (same 32 output lanes).
    w_att_v1 = jnp.concatenate([
        jnp.concatenate([params["attn_Wh_w"].T, params["attn_Ws_w"].T], axis=0),  # (4H, H)
        params["lin_V1_w"].T,                                                     # (4H, H)
    ], axis=0)                                                     # (8H, H) = (256, 32)

    w_v2 = params["lin_V2_w"].T                                    # (H, O)

    return {
        "embedding": params["embedding"],
        "wpack": wpack,
        "w_att_v1": w_att_v1,
        "w_v2": w_v2,
    }


@jax.jit
def attn_decoder_lstm2_step(kparams, token, hidden, h_enc):
    """Forward pass equivalent to AttnDecoderLSTM2.forward(input, hidden, h)."""
    H, E, O = HIDDEN_SIZE, EMBEDDING_SIZE, OUTPUT_SIZE
    h0, c0 = hidden                                      # each (2, 1, H)

    # Embedding lookup (gather) stays in plain JAX glue.
    emb = kparams["embedding"][token].reshape(1, E)

    vmem = pl.BlockSpec(memory_space=pltpu.MemorySpace.VMEM)
    pvocab, state = pl.pallas_call(
        _decoder_kernel,
        out_shape=(
            jax.ShapeDtypeStruct((1, O), jnp.float32),
            jax.ShapeDtypeStruct((4, H), jnp.float32),
        ),
        in_specs=[vmem] * 7,
        out_specs=(vmem, vmem),
    )(emb, h0.reshape(2, H), c0.reshape(2, H), h_enc,
      kparams["wpack"], kparams["w_att_v1"], kparams["w_v2"])

    h_n = state[0:2].reshape(2, 1, H)
    c_n = state[2:4].reshape(2, 1, H)
    return pvocab, (h_n, c_n)


def reference(params, token, hidden, h_enc):
    """Pure-JAX reference mirroring the torch forward (for a correctness check)."""
    h0, c0 = hidden
    emb = params["embedding"][token].reshape(1, -1)

    def cell(d):
        gates = (emb @ params["w_ih"][d].T + params["b_ih"][d]
                 + h0[d] @ params["w_hh"][d].T + params["b_hh"][d])
        i, f, g, o = jnp.split(gates, 4, axis=1)
        i, f, g, o = jax.nn.sigmoid(i), jax.nn.sigmoid(f), jnp.tanh(g), jax.nn.sigmoid(o)
        c_new = f * c0[d] + i * g
        return o * jnp.tanh(c_new), c_new

    (h_f, c_f), (h_b, c_b) = cell(0), cell(1)
    h_n = jnp.stack([h_f, h_b])
    c_n = jnp.stack([c_f, c_b])
    s_t = jnp.concatenate([h_n[0], c_n[0]], axis=1)            # (1, 2H)

    Wh = h_enc @ params["attn_Wh_w"].T + params["attn_Wh_b"]
    Ws_t = s_t @ params["attn_Ws_w"].T + params["attn_Ws_b"]
    t = jnp.tanh(Wh + Ws_t)
    e = t @ params["attn_v_w"].T + params["attn_v_b"]          # (L, 1)
    a = jax.nn.softmax(e.T, axis=1)                            # (1, L)
    hstar = a @ h_enc                                          # (1, 2H)
    v1 = jnp.concatenate([s_t, hstar], axis=1) @ params["lin_V1_w"].T + params["lin_V1_b"]
    v2 = v1 @ params["lin_V2_w"].T + params["lin_V2_b"]
    return jax.nn.softmax(v2, axis=1), (h_n, c_n)


if __name__ == "__main__":
    key = jax.random.PRNGKey(0)
    k_par, k_h0, k_c0, k_enc = jax.random.split(key, 4)

    params = init_params(k_par)
    kparams = prepare_kernel_params(params)          # one-time, outside the decode step

    token = jnp.array(3, dtype=jnp.int32)
    hidden0 = (0.1 * jax.random.normal(k_h0, (2, 1, HIDDEN_SIZE), jnp.float32),
               0.1 * jax.random.normal(k_c0, (2, 1, HIDDEN_SIZE), jnp.float32))
    h_enc = 0.1 * jax.random.normal(k_enc, (MAX_LENGTH, 2 * HIDDEN_SIZE), jnp.float32)

    pvocab, (h_n, c_n) = attn_decoder_lstm2_step(kparams, token, hidden0, h_enc)
    jax.block_until_ready((pvocab, h_n, c_n))

    # Sanity check against the pure-JAX reference.
    pv_ref, (hn_ref, cn_ref) = reference(params, token, hidden0, h_enc)
    assert pvocab.shape == (1, OUTPUT_SIZE)
    assert h_n.shape == (2, 1, HIDDEN_SIZE) and c_n.shape == (2, 1, HIDDEN_SIZE)
    assert jnp.allclose(pvocab, pv_ref, atol=1e-3), "Pvocab mismatch"
    assert jnp.allclose(h_n, hn_ref, atol=1e-3), "h_n mismatch"
    assert jnp.allclose(c_n, cn_ref, atol=1e-3), "c_n mismatch"
    assert jnp.allclose(jnp.sum(pvocab), 1.0, atol=1e-4)

    print("KERNEL_OK")
</pallas_src>

<mosaic_0001>
module attributes {stable_mosaic.version = 11 : i64} {
  func.func @_decoder_kernel(%arg0: memref<1x16xf32, #tpu.memory_space<vmem>>, %arg1: memref<2x32xf32, #tpu.memory_space<vmem>>, %arg2: memref<2x32xf32, #tpu.memory_space<vmem>>, %arg3: memref<8x64xf32, #tpu.memory_space<vmem>>, %arg4: memref<104x128xf32, #tpu.memory_space<vmem>>, %arg5: memref<256x32xf32, #tpu.memory_space<vmem>>, %arg6: memref<32x40xf32, #tpu.memory_space<vmem>>, %arg7: memref<1x40xf32, #tpu.memory_space<vmem>>, %arg8: memref<4x32xf32, #tpu.memory_space<vmem>>) attributes {dimension_semantics = [], scalar_prefetch = 0 : i64, scratch_operands = 0 : i64, tpu.core_type = #tpu.core_type<tc>} {
    %c0 = arith.constant 0 : index
    %c0_0 = arith.constant 0 : index
    %0 = vector.load %arg0[%c0, %c0_0] : memref<1x16xf32, #tpu.memory_space<vmem>>, vector<1x16xf32>
    %c0_1 = arith.constant 0 : index
    %c0_2 = arith.constant 0 : index
    %1 = vector.load %arg1[%c0_1, %c0_2] : memref<2x32xf32, #tpu.memory_space<vmem>>, vector<1x32xf32>
    %c0_3 = arith.constant 0 : index
    %c0_4 = arith.constant 0 : index
    %2 = vector.load %arg2[%c0_3, %c0_4] : memref<2x32xf32, #tpu.memory_space<vmem>>, vector<1x32xf32>
    %3 = tpu.concatenate %0, %1 in 1 : vector<1x16xf32>, vector<1x32xf32> -> vector<1x48xf32>
    %c0_5 = arith.constant 0 : index
    %c0_6 = arith.constant 0 : index
    %4 = vector.load %arg4[%c0_5, %c0_6] : memref<104x128xf32, #tpu.memory_space<vmem>>, vector<48x128xf32>
    %cst = arith.constant dense<0.000000e+00> : vector<1x128xf32>
    %5 = tpu.matmul %3, %4, %cst {dimension_numbers = #tpu.dot_dimension_numbers<[1], [0], [0], [1], [0, 0, 1, 1], [], []>} : vector<1x48xf32>, vector<48x128xf32>, vector<1x128xf32> -> vector<1x128xf32>
    %c96 = arith.constant 96 : index
    %c0_7 = arith.constant 0 : index
    %6 = vector.load %arg4[%c96, %c0_7] : memref<104x128xf32, #tpu.memory_space<vmem>>, vector<1x128xf32>
    %7 = arith.addf %5, %6 : vector<1x128xf32>
    %8 = arith.negf %7 : vector<1x128xf32>
    %9 = math.exp %8 : vector<1x128xf32>
    %cst_8 = arith.constant 1.000000e+00 : f32
    %10 = vector.broadcast %cst_8 : f32 to vector<1x128xf32>
    %11 = arith.addf %10, %9 : vector<1x128xf32>
    %12 = arith.divf %10, %11 : vector<1x128xf32>
    %13 = math.tanh %7 : vector<1x128xf32>
    %14 = vector.extract_strided_slice %12 {offsets = [0, 0], sizes = [1, 32], strides = [1, 1]} : vector<1x128xf32> to vector<1x32xf32>
    %15 = vector.extract_strided_slice %12 {offsets = [0, 32], sizes = [1, 32], strides = [1, 1]} : vector<1x128xf32> to vector<1x32xf32>
    %16 = vector.extract_strided_slice %13 {offsets = [0, 64], sizes = [1, 32], strides = [1, 1]} : vector<1x128xf32> to vector<1x32xf32>
    %17 = vector.extract_strided_slice %12 {offsets = [0, 96], sizes = [1, 32], strides = [1, 1]} : vector<1x128xf32> to vector<1x32xf32>
    %18 = arith.mulf %15, %2 : vector<1x32xf32>
    %19 = arith.mulf %14, %16 : vector<1x32xf32>
    %20 = arith.addf %18, %19 : vector<1x32xf32>
    %21 = math.tanh %20 : vector<1x32xf32>
    %22 = arith.mulf %17, %21 : vector<1x32xf32>
    %c1 = arith.constant 1 : index
    %c0_9 = arith.constant 0 : index
    %23 = vector.load %arg1[%c1, %c0_9] : memref<2x32xf32, #tpu.memory_space<vmem>>, vector<1x32xf32>
    %c1_10 = arith.constant 1 : index
    %c0_11 = arith.constant 0 : index
    %24 = vector.load %arg2[%c1_10, %c0_11] : memref<2x32xf32, #tpu.memory_space<vmem>>, vector<1x32xf32>
    %25 = tpu.concatenate %0, %23 in 1 : vector<1x16xf32>, vector<1x32xf32> -> vector<1x48xf32>
    %c48 = arith.constant 48 : index
    %c0_12 = arith.constant 0 : index
    %26 = vector.load %arg4[%c48, %c0_12] : memref<104x128xf32, #tpu.memory_space<vmem>>, vector<48x128xf32>
    %cst_13 = arith.constant dense<0.000000e+00> : vector<1x128xf32>
    %27 = tpu.matmul %25, %26, %cst_13 {dimension_numbers = #tpu.dot_dimension_numbers<[1], [0], [0], [1], [0, 0, 1, 1], [], []>} : vector<1x48xf32>, vector<48x128xf32>, vector<1x128xf32> -> vector<1x128xf32>
    %c97 = arith.constant 97 : index
    %c0_14 = arith.constant 0 : index
    %28 = vector.load %arg4[%c97, %c0_14] : memref<104x128xf32, #tpu.memory_space<vmem>>, vector<1x128xf32>
    %29 = arith.addf %27, %28 : vector<1x128xf32>
    %30 = arith.negf %29 : vector<1x128xf32>
    %31 = math.exp %30 : vector<1x128xf32>
    %cst_15 = arith.constant 1.000000e+00 : f32
    %32 = vector.broadcast %cst_15 : f32 to vector<1x128xf32>
    %33 = arith.addf %32, %31 : vector<1x128xf32>
    %34 = arith.divf %32, %33 : vector<1x128xf32>
    %35 = math.tanh %29 : vector<1x128xf32>
    %36 = vector.extract_strided_slice %34 {offsets = [0, 0], sizes = [1, 32], strides = [1, 1]} : vector<1x128xf32> to vector<1x32xf32>
    %37 = vector.extract_strided_slice %34 {offsets = [0, 32], sizes = [1, 32], strides = [1, 1]} : vector<1x128xf32> to vector<1x32xf32>
    %38 = vector.extract_strided_slice %35 {offsets = [0, 64], sizes = [1, 32], strides = [1, 1]} : vector<1x128xf32> to vector<1x32xf32>
    %39 = vector.extract_strided_slice %34 {offsets = [0, 96], sizes = [1, 32], strides = [1, 1]} : vector<1x128xf32> to vector<1x32xf32>
    %40 = arith.mulf %37, %24 : vector<1x32xf32>
    %41 = arith.mulf %36, %38 : vector<1x32xf32>
    %42 = arith.addf %40, %41 : vector<1x32xf32>
    %43 = math.tanh %42 : vector<1x32xf32>
    %44 = arith.mulf %39, %43 : vector<1x32xf32>
    %45 = tpu.concatenate %22, %44, %20, %42 in 0 : vector<1x32xf32>, vector<1x32xf32>, vector<1x32xf32>, vector<1x32xf32> -> vector<4x32xf32>
    %c0_16 = arith.constant 0 : index
    %c0_17 = arith.constant 0 : index
    %46 = vector.load %arg8[%c0_16, %c0_17] : memref<4x32xf32, #tpu.memory_space<vmem>>, vector<4x32xf32>
    tpu.vector_store %arg8[%c0_16, %c0_17], %45 {strides = array<i32>} : memref<4x32xf32, #tpu.memory_space<vmem>>, vector<4x32xf32>,
    %47 = tpu.concatenate %22, %20 in 1 : vector<1x32xf32>, vector<1x32xf32> -> vector<1x64xf32>
    %c0_18 = arith.constant 0 : index
    %c0_19 = arith.constant 0 : index
    %48 = vector.load %arg3[%c0_18, %c0_19] : memref<8x64xf32, #tpu.memory_space<vmem>>, vector<8x64xf32>
    %49 = vector.shape_cast %47 : vector<1x64xf32> to vector<1x64xf32>
    %50 = vector.broadcast %49 : vector<1x64xf32> to vector<8x64xf32>
    %51 = tpu.concatenate %48, %50 in 1 : vector<8x64xf32>, vector<8x64xf32> -> vector<8x128xf32>
    %c0_20 = arith.constant 0 : index
    %c0_21 = arith.constant 0 : index
    %52 = vector.load %arg5[%c0_20, %c0_21] : memref<256x32xf32, #tpu.memory_space<vmem>>, vector<128x32xf32>
    %c98 = arith.constant 98 : index
    %c0_22 = arith.constant 0 : index
    %53 = vector.load %arg4[%c98, %c0_22] : memref<104x128xf32, #tpu.memory_space<vmem>>, vector<1x128xf32>
    %54 = vector.extract_strided_slice %53 {offsets = [0, 0], sizes = [1, 32], strides = [1, 1]} : vector<1x128xf32> to vector<1x32xf32>
    %cst_23 = arith.constant dense<0.000000e+00> : vector<8x32xf32>
    %55 = tpu.matmul %51, %52, %cst_23 {dimension_numbers = #tpu.dot_dimension_numbers<[1], [0], [0], [1], [0, 0, 1, 1], [], []>} : vector<8x128xf32>, vector<128x32xf32>, vector<8x32xf32> -> vector<8x32xf32>
    %56 = vector.broadcast %54 : vector<1x32xf32> to vector<8x32xf32>
    %57 = arith.addf %55, %56 : vector<8x32xf32>
    %58 = math.tanh %57 : vector<8x32xf32>
    %c99 = arith.constant 99 : index
    %c0_24 = arith.constant 0 : index
    %59 = vector.load %arg4[%c99, %c0_24] : memref<104x128xf32, #tpu.memory_space<vmem>>, vector<1x128xf32>
    %60 = vector.extract_strided_slice %59 {offsets = [0, 0], sizes = [1, 32], strides = [1, 1]} : vector<1x128xf32> to vector<1x32xf32>
    %c100 = arith.constant 100 : index
    %c0_25 = arith.constant 0 : index
    %61 = vector.load %arg4[%c100, %c0_25] : memref<104x128xf32, #tpu.memory_space<vmem>>, vector<1x128xf32>
    %62 = vector.extract_strided_slice %61 {offsets = [0, 0], sizes = [1, 1], strides = [1, 1]} : vector<1x128xf32> to vector<1x1xf32>
    %63 = vector.broadcast %60 : vector<1x32xf32> to vector<8x32xf32>
    %64 = arith.mulf %58, %63 : vector<8x32xf32>
    %cst_26 = arith.constant dense<0.000000e+00> : vector<8xf32>
    %65 = vector.multi_reduction <add>, %64, %cst_26 [1] : vector<8x32xf32> to vector<8xf32>
    %66 = vector.shape_cast %65 : vector<8xf32> to vector<8x1xf32>
    %67 = vector.broadcast %62 : vector<1x1xf32> to vector<8x1xf32>
    %68 = arith.addf %66, %67 : vector<8x1xf32>
    %cst_27 = arith.constant dense<0xFF800000> : vector<1xf32>
    %69 = vector.multi_reduction <maximumf>, %68, %cst_27 [0] : vector<8x1xf32> to vector<1xf32>
    %70 = vector.shape_cast %69 : vector<1xf32> to vector<1x1xf32>
    %71 = vector.broadcast %70 : vector<1x1xf32> to vector<8x1xf32>
    %72 = arith.subf %68, %71 : vector<8x1xf32>
    %73 = math.exp %72 : vector<8x1xf32>
    %cst_28 = arith.constant dense<0.000000e+00> : vector<1xf32>
    %74 = vector.multi_reduction <add>, %73, %cst_28 [0] : vector<8x1xf32> to vector<1xf32>
    %75 = vector.shape_cast %74 : vector<1xf32> to vector<1x1xf32>
    %76 = tpu.reciprocal %75 {approx = true} : vector<1x1xf32> -> vector<1x1xf32>
    %77 = vector.broadcast %76 : vector<1x1xf32> to vector<8x1xf32>
    %78 = arith.mulf %73, %77 : vector<8x1xf32>
    %79 = vector.broadcast %78 : vector<8x1xf32> to vector<8x64xf32>
    %80 = arith.mulf %79, %48 : vector<8x64xf32>
    %cst_29 = arith.constant dense<0.000000e+00> : vector<64xf32>
    %81 = vector.multi_reduction <add>, %80, %cst_29 [0] : vector<8x64xf32> to vector<64xf32>
    %82 = vector.shape_cast %81 : vector<64xf32> to vector<1x64xf32>
    %83 = tpu.concatenate %47, %82 in 1 : vector<1x64xf32>, vector<1x64xf32> -> vector<1x128xf32>
    %c128 = arith.constant 128 : index
    %c0_30 = arith.constant 0 : index
    %84 = vector.load %arg5[%c128, %c0_30] : memref<256x32xf32, #tpu.memory_space<vmem>>, vector<128x32xf32>
    %cst_31 = arith.constant dense<0.000000e+00> : vector<1x32xf32>
    %85 = tpu.matmul %83, %84, %cst_31 {dimension_numbers = #tpu.dot_dimension_numbers<[1], [0], [0], [1], [0, 0, 1, 1], [], []>} : vector<1x128xf32>, vector<128x32xf32>, vector<1x32xf32> -> vector<1x32xf32>
    %c101 = arith.constant 101 : index
    %c0_32 = arith.constant 0 : index
    %86 = vector.load %arg4[%c101, %c0_32] : memref<104x128xf32, #tpu.memory_space<vmem>>, vector<1x128xf32>
    %87 = vector.extract_strided_slice %86 {offsets = [0, 0], sizes = [1, 32], strides = [1, 1]} : vector<1x128xf32> to vector<1x32xf32>
    %88 = arith.addf %85, %87 : vector<1x32xf32>
    %c0_33 = arith.constant 0 : index
    %c0_34 = arith.constant 0 : index
    %89 = vector.load %arg6[%c0_33, %c0_34] : memref<32x40xf32, #tpu.memory_space<vmem>>, vector<32x40xf32>
    %cst_35 = arith.constant dense<0.000000e+00> : vector<1x40xf32>
    %90 = tpu.matmul %88, %89, %cst_35 {dimension_numbers = #tpu.dot_dimension_numbers<[1], [0], [0], [1], [0, 0, 1, 1], [], []>} : vector<1x32xf32>, vector<32x40xf32>, vector<1x40xf32> -> vector<1x40xf32>
    %c102 = arith.constant 102 : index
    %c0_36 = arith.constant 0 : index
    %91 = vector.load %arg4[%c102, %c0_36] : memref<104x128xf32, #tpu.memory_space<vmem>>, vector<1x128xf32>
    %92 = vector.extract_strided_slice %91 {offsets = [0, 0], sizes = [1, 40], strides = [1, 1]} : vector<1x128xf32> to vector<1x40xf32>
    %93 = arith.addf %90, %92 : vector<1x40xf32>
    %cst_37 = arith.constant dense<0xFF800000> : vector<1xf32>
    %94 = vector.multi_reduction <maximumf>, %93, %cst_37 [1] : vector<1x40xf32> to vector<1xf32>
    %95 = vector.shape_cast %94 : vector<1xf32> to vector<1x1xf32>
    %96 = vector.broadcast %95 : vector<1x1xf32> to vector<1x40xf32>
    %97 = arith.subf %93, %96 : vector<1x40xf32>
    %98 = math.exp %97 : vector<1x40xf32>
    %cst_38 = arith.constant dense<0.000000e+00> : vector<1xf32>
    %99 = vector.multi_reduction <add>, %98, %cst_38 [1] : vector<1x40xf32> to vector<1xf32>
    %100 = vector.shape_cast %99 : vector<1xf32> to vector<1x1xf32>
    %101 = vector.broadcast %100 : vector<1x1xf32> to vector<1x40xf32>
    %102 = arith.divf %98, %101 : vector<1x40xf32>
    %c0_39 = arith.constant 0 : index
    %c0_40 = arith.constant 0 : index
    %103 = vector.load %arg7[%c0_39, %c0_40] : memref<1x40xf32, #tpu.memory_space<vmem>>, vector<1x40xf32>
    tpu.vector_store %arg7[%c0_39, %c0_40], %102 {strides = array<i32>} : memref<1x40xf32, #tpu.memory_space<vmem>>, vector<1x40xf32>,
    return
  }
}

</mosaic_0001>

<bundles_post_ra>
// kernel: attn_decoder_lstm2_step.1
= control target key start
LH: loop header
LB: loop body
LE: loop exit
PB: predicated region body
PF: predicated region fallthrough
CT: control target
= control target key end

     0   :  { %s491_s11 = smov 16   ;;  %s782_s0 = inlined_call_operand.vmem [shape: f32[1,16], index: 0, kind: input, shape index: {}]   ;;  %s783_s1 = inlined_call_operand.vmem [shape: f32[2,32], index: 1, kind: input, shape index: {}]   ;;  %s784_s2 = inlined_call_operand.vmem [shape: f32[2,32], index: 2, kind: input, shape index: {}]   ;;  %s785_s3 = inlined_call_operand.vmem [shape: f32[8,64], index: 3, kind: input, shape index: {}]   ;;  %s786_s4 = inlined_call_operand.vmem [shape: f32[104,128], index: 4, kind: input, shape index: {}]   ;;  %s787_s5 = inlined_call_operand.vmem [shape: f32[256,32], index: 5, kind: input, shape index: {}]   ;;  %s788_s6 = inlined_call_operand.vmem [shape: f32[32,40], index: 6, kind: input, shape index: {}]   ;;  %s789_s7 = inlined_call_operand.hbm [shape: f32[1,40], index: 7, kind: output, shape index: {0}]   ;;  %s790_s8 = inlined_call_operand.vmem [shape: f32[4,32], index: 8, kind: output, shape index: {1}]  }
   0x1   :  { %v30_v0 = vld [vmem:[%s783_s1] sm:$0x1]  ;;  %v43_v1 = vld [vmem:[%s786_s4 + $0x28] sm:$0xff]  ;;  %v41_v3 = vld [vmem:[%s786_s4 + $0x18] sm:$0xff] }
   0x2   :  { %v42_v2 = vld [vmem:[%s786_s4 + $0x20] sm:$0xff]  ;;  %33 = vrot.lane.b32.xlu0 %v30_v0, %s491_s11  ;;  %59 = vmatpush.msra.mxu0 %v43_v1 }
   0x4   :  { %60 = vmatpush.msra.mxu0 %v42_v2 }
   0x5   :  { %14 = vsyncpa [#allocation3], 0  ;;  %v40_v4 = vld [vmem:[%s786_s4 + $0x10] sm:$0xff]  ;;  %v39_v5 = vld [vmem:[%s786_s4 + $0x8] sm:$0xff]  ;;  %s492_s22 = smov 32   ;;  %vm36_vm0 = vcmask 130048  }
   0x6   :  { %61 = vmatpush.msra.mxu0 %v41_v3  ;;  %v38_v6 = vld [vmem:[%s786_s4] sm:$0xff]  ;;  %vm45_vm1 = vcmask 392192   ;;  %s493_s27 = smov 64   ;;  %v242_v37 = vld [vmem:[%s787_s5 + $0x78] sm:$0xff]  ;;  %v241_v38 = vld [vmem:[%s787_s5 + $0x70] sm:$0xff]  ;;  %vm217_vm6 = vcmask 261120  }
   0x7   :  { %v31_v7 = vld [vmem:[%s784_s2] sm:$0x1]  ;;  %245 = vmatpush.msra.mxu2 %v242_v37  ;;  %v240_v39 = vld [vmem:[%s787_s5 + $0x68] sm:$0xff]  ;;  %v238_v41 = vld [vmem:[%s787_s5 + $0x58] sm:$0xff]  ;;  %vm225_vm7 = vcmask 523264   ;;  %vm275_vm8 = vcmask 7168  }
   0x8   :  { %62 = vmatpush.msra.mxu0 %v40_v4  ;;  %90 = vrot.lane.b32.xlu1 %v31_v7, %s492_s22  ;;  %v570_v8 = vld [vmem:[%s782_s0] sm:$0x1]  ;;  %v237_v42 = vld [vmem:[%s787_s5 + $0x50] sm:$0xff]  ;;  %v236_v43 = vld [vmem:[%s787_s5 + $0x48] sm:$0xff]  ;;  %vm378_vm13 = vcmask 319488   ;;  %vm201_vm14 = vcmask 1040384  }
   0x9   :  { %v44_v11 = vld [vmem:[%s786_s4 + $0x60] sm:$0x1]  ;;  %246 = vmatpush.msra.mxu2 %v241_v38  ;;  %v234_v45 = vld [vmem:[%s787_s5 + $0x38] sm:$0xff]  ;;  %v233_v46 = vld [vmem:[%s787_s5 + $0x30] sm:$0xff]  ;;  %vm203_vm15 = vcmask 1041408   ;;  %s411_s18 = sshll.u32 %s789_s7, 4  ;;  %s412_s18 = int_to_ptr.hbm [resolvable:$true] %s411_s18 }
   0xa   :  { %63 = vmatpush.msra.mxu0 %v39_v5  ;;  %v239_v40 = vld [vmem:[%s787_s5 + $0x60] sm:$0xff]  ;;  %v232_v47 = vld [vmem:[%s787_s5 + $0x28] sm:$0xff]  ;;  %v230_v49 = vld [vmem:[%s787_s5 + $0x18] sm:$0xff] }
   0xb   :  { %247 = vmatpush.msra.mxu2 %v240_v39  ;;  %v235_v44 = vld [vmem:[%s787_s5 + $0x40] sm:$0xff]  ;;  %v229_v50 = vld [vmem:[%s787_s5 + $0x10] sm:$0xff]  ;;  %v228_v51 = vld [vmem:[%s787_s5 + $0x8] sm:$0xff] }
   0xc   :  { %64 = vmatpush.msra.mxu0 %v38_v6  ;;  %v231_v48 = vld [vmem:[%s787_s5 + $0x20] sm:$0xff]  ;;  %v326_v37 = vld [vmem:[%s787_s5 + $0xe8] sm:$0xff] }
   0xd   :  { %248 = vmatpush.msra.mxu2 %v239_v40  ;;  %v227_v55 = vld [vmem:[%s787_s5] sm:$0xff]  ;;  %v324_v40 = vld [vmem:[%s787_s5 + $0xd8] sm:$0xff] }
   0xe   :  { %v645_v56 = vld [vmem:[%s785_s3] sm:$0xff] }
   0xf   :  { %249 = vmatpush.msra.mxu2 %v238_v41  ;;  %v436_v59 = vld [vmem:[%s786_s4 + $0x62] ss:$0 sm:$0xff]  ;;  %v437_v62 = vld [vmem:[%s786_s4 + $0x63] ss:$0 sm:$0xff]  ;;  %v438_v2 = vld [vmem:[%s786_s4 + $0x64] ss:$0 sm:$0xff] }
  0x10   :  { %v111_v38 = vld [vmem:[%s784_s2 + $0x1] sm:$0x1]  ;;  %v323_v41 = vld [vmem:[%s787_s5 + $0xd0] sm:$0xff] }
  0x11   :  { %250 = vmatpush.msra.mxu2 %v237_v42  ;;  %v325_v39 = vld [vmem:[%s787_s5 + $0xe0] sm:$0xff]  ;;  %v322_v42 = vld [vmem:[%s787_s5 + $0xc8] sm:$0xff] }
  0x13   :  { %251 = vmatpush.msra.mxu2 %v236_v43  ;;  %v321_v43 = vld [vmem:[%s787_s5 + $0xc0] sm:$0xff] }
  0x15   :  { %252 = vmatpush.msra.mxu2 %v235_v44  ;;  %v320_v44 = vld [vmem:[%s787_s5 + $0xb8] sm:$0xff] }
  0x17   :  { %253 = vmatpush.msra.mxu2 %v234_v45 }
  0x19   :  { %254 = vmatpush.msra.mxu2 %v233_v46  ;;  %v319_v46 = vld [vmem:[%s787_s5 + $0xb0] sm:$0xff] }
  0x1b   :  { %255 = vmatpush.msra.mxu2 %v232_v47 }
  0x1d   :  { %256 = vmatpush.msra.mxu2 %v231_v48  ;;  %v318_v48 = vld [vmem:[%s787_s5 + $0xa8] sm:$0xff] }
  0x1f   :  { %257 = vmatpush.msra.mxu2 %v230_v49 }
  0x21   :  { %258 = vmatpush.msra.mxu2 %v229_v50 }
  0x23   :  { %259 = vmatpush.msra.mxu2 %v228_v51  ;;  %v317_v51 = vld [vmem:[%s787_s5 + $0xa0] sm:$0xff] }
  0x25   :  { %260 = vmatpush.msra.mxu2 %v227_v55 }
  0x74   :  { %v34_v9 = vpop.permute.xlu0 %33 }
  0x75   :  { %v37_v10 = vsel %vm36_vm0, %v570_v8, %v34_v9 }
  0x76   :  { %424 = vmatmul.msk.f32.vlgmr.msra.gmra.mxu0 %vm45_vm1, %v37_v10  ;;  %v494_v10 = vmov 0  }
  0x77   :  { %434 = vset.pattern.permute.xlu2 %v494_v10  ;;  %435 = vset.pattern.permute.xlu0 %v494_v10  ;;  %v351_v10 = vld [vmem:[%s788_s6 + $0x8] sm:$0xff] }
  0x7a   :  { %v91_v30 = vpop.permute.xlu1 %90 }
  0xf3   :  { %v66_v12 = vpop.f32.mrf.mxu0 }
  0xf4   :  { %v67_v13 = vadd.f32 %v66_v12, %v44_v11 }
  0xf6   :  { %439 = vtanh.f32 %v67_v13  ;;  %v425_v15 = vmul.f32 -1.442695, %v67_v13 }
  0xf8   :  { %441 = vpow2.f32 %v425_v15 }
  0xfc   :  { %v440_v14 = vpop.eup %439 }
  0xfd   :  { %95 = vrot.lane.b32.xlu0 %v440_v14, %s493_s27 }
  0xfe   :  { %v442_v16 = vpop.eup %441 }
  0xff   :  { %v72_v17 = vadd.f32 1.0, %v442_v16  ;;  %v122_v16 = vld [vmem:[%s786_s4 + $0x58] sm:$0xff] }
 0x100   :  { %137 = vmatpush.msra.mxu1 %v122_v16 }
 0x101   :  { %443 = vrcp.f32 %v72_v17  ;;  %v84_v23 = vand.u32 2147483648, %v72_v17  ;;  %vm78_vm3 = vweird.f32 %v72_v17  ;;  %v82_v24 = vand.u32 2147483647, %v72_v17 }
 0x103   :  { %v85_v26 = vor.u32 1.1754944e-38, %v84_v23  ;;  %vm83_vm5 = vcmp.eq.f32.partialorder %v82_v24, 8.507059e+37 }
 0x107   :  { %v444_v18 = vpop.eup %443 }
 0x108   :  { %v74_v19 = vmul.f32 %v444_v18, %v72_v17  ;;  %vm79_vm2 = vweird.f32 %v444_v18 }
 0x109   :  { %vm80_vm4 = vmor %vm78_vm3, %vm79_vm2 }
 0x10a   :  { %v75_v20 = vsub.f32 1.0, %v74_v19 }
 0x10c   :  { %v76_v21 = vmul.f32 %v444_v18, %v75_v20 }
 0x10e   :  { %v77_v22 = vadd.f32 %v444_v18, %v76_v21 }
 0x110   :  { %v81_v25 = vsel %vm80_vm4, %v444_v18, %v77_v22 }
 0x111   :  { %v86_v27 = vsel %vm83_vm5, %v85_v26, %v81_v25 }
 0x112   :  { %v93_v31 = vmul.f32 %v91_v30, %v86_v27  ;;  %v119_v30 = vld [vmem:[%s786_s4 + $0x40] sm:$0xff] }
 0x16f   :  { %v96_v28 = vpop.permute.xlu0 %95 }
 0x170   :  { %v98_v29 = vmul.f32 %v96_v28, %v86_v27  ;;  %v121_v28 = vld [vmem:[%s786_s4 + $0x50] sm:$0xff] }
 0x171   :  { %138 = vmatpush.msra.mxu1 %v121_v28 }
 0x172   :  { %100 = vrot.lane.b32.xlu1 %v98_v29, %s492_s22  ;;  %v120_v29 = vld [vmem:[%s786_s4 + $0x48] sm:$0xff] }
 0x173   :  { %139 = vmatpush.msra.mxu1 %v120_v29 }
 0x175   :  { %140 = vmatpush.msra.mxu1 %v119_v30 }
 0x1e4   :  { %v101_v32 = vpop.permute.xlu1 %100 }
 0x1e5   :  { %v580_v33 = vadd.f32 %v101_v32, %v93_v31  ;;  %v118_v31 = vld [vmem:[%s786_s4 + $0x38] sm:$0xff]  ;;  %v117_v32 = vld [vmem:[%s786_s4 + $0x30] sm:$0xff] }
 0x1e6   :  { %141 = vmatpush.msra.mxu1 %v118_v31 }
 0x1e7   :  { %445 = vtanh.f32 %v580_v33 }
 0x1e8   :  { %142 = vmatpush.msra.mxu1 %v117_v32 }
 0x1ed   :  { %v446_v34 = vpop.eup %445 }
 0x1ee   :  { %106 = vrot.lane.b32.xlu2 %v446_v34, %s493_s27  ;;  %v328_v34 = vld [vmem:[%s787_s5 + $0xf8] sm:$0xff] }
 0x1ef   :  { %330 = vmatpush.msra.mxu3 %v328_v34  ;;  %v354_v34 = vld [vmem:[%s786_s4 + $0x66] sm:$0x1] }
 0x248   :  { %v107_v35 = vpop.permute.xlu2 %106 }
 0x249   :  { %v584_v36 = vmul.f32 %v107_v35, %v86_v27  ;;  %v110_v27 = vld [vmem:[%s783_s1 + $0x1] sm:$0x1]  ;;  %v327_v35 = vld [vmem:[%s787_s5 + $0xf0] sm:$0xff] }
 0x24a   :  { %331 = vmatpush.msra.mxu3 %v327_v35 }
 0x24b   :  { %214 = vrot.lane.b32.xlu2 %v584_v36, %s492_s22 }
 0x24c   :  { %332 = vmatpush.msra.mxu3 %v326_v37 }
 0x24e   :  { %333 = vmatpush.msra.mxu3 %v325_v39 }
 0x250   :  { %334 = vmatpush.msra.mxu3 %v324_v40 }
 0x252   :  { %335 = vmatpush.msra.mxu3 %v323_v41 }
 0x254   :  { %336 = vmatpush.msra.mxu3 %v322_v42 }
 0x256   :  { %337 = vmatpush.msra.mxu3 %v321_v43 }
 0x258   :  { %338 = vmatpush.msra.mxu3 %v320_v44 }
 0x25a   :  { %339 = vmatpush.msra.mxu3 %v319_v46 }
 0x25c   :  { %340 = vmatpush.msra.mxu3 %v318_v48 }
 0x25e   :  { %341 = vmatpush.msra.mxu3 %v317_v51 }
 0x2a5   :  { %v215_v52 = vpop.permute.xlu2 %214 }
 0x2a6   :  { %v635_v53 = vsel %vm217_vm6, %v215_v52, %v580_v33 }
 0x2a7   :  { %v220_v54 = vperm.slane %v635_v53, 0 }
 0x2a9   :  { %222 = vrot.lane.b32.xlu0 %v220_v54, %s493_s27  ;;  %v316_v54 = vld [vmem:[%s787_s5 + $0x98] sm:$0xff] }
 0x2aa   :  { %342 = vmatpush.msra.mxu3 %v316_v54 }
 0x31b   :  { %v223_v57 = vpop.permute.xlu0 %222 }
 0x31c   :  { %v226_v58 = vsel %vm225_vm7, %v645_v56, %v223_v57  ;;  %v315_v57 = vld [vmem:[%s787_s5 + $0x90] sm:$0xff] }
 0x31d   :  { %261 = vmatmul.f32.vlgmr.msra.gmra.mxu2 %v226_v58  ;;  %343 = vmatpush.msra.mxu3 %v315_v57 }
 0x3a0   :  { %v262_v60 = vpop.f32.mrf.mxu2 }
 0x3a1   :  { %v263_v61 = vadd.f32 %v436_v59, %v262_v60  ;;  %v314_v60 = vld [vmem:[%s787_s5 + $0x88] sm:$0xff] }
 0x3a2   :  { %344 = vmatpush.msra.mxu3 %v314_v60 }
 0x3a3   :  { %447 = vtanh.f32 %v263_v61 }
 0x3a9   :  { %v448_v63 = vpop.eup %447 }
 0x3aa   :  { %v269_v0 = vmul.f32 %v448_v63, %v437_v62  ;;  %v313_v63 = vld [vmem:[%s787_s5 + $0x80] sm:$0xff] }
 0x3ab   :  { %345 = vmatpush.msra.mxu3 %v313_v63 }
 0x3ac   :  { %v270_v1 = vsel %vm217_vm6, %v269_v0, 0.0 }
 0x3ad   :  { %271 = vadd.xlane.f32.xlu1 %v270_v1  ;;  %v123_v1 = vld [vmem:[%s786_s4 + $0x61] sm:$0x1] }
 0x420   :  { %v272_v3 = vpop.xlane.xlu1 %271 }
 0x421   :  { %v274_v4 = vadd.f32 %v438_v2, %v272_v3  ;;  %v353_v2 = vld [vmem:[%s788_s6 + $0x18] sm:$0xff] }
 0x422   :  { %370 = vmatpush.msrb.mxu0 %v353_v2 }
 0x423   :  { %v276_v5 = vsel %vm275_vm8, %v274_v4, -inf }
 0x424   :  { %v277_v6 = vrot.slane %v276_v5, 4 }
 0x426   :  { %v278_v7 = vmax.f32 %v276_v5, %v277_v6 }
 0x428   :  { %v279_v9 = vrot.slane %v278_v7, 2 }
 0x42a   :  { %v280_v11 = vmax.f32 %v278_v7, %v279_v9  ;;  %v352_v9 = vld [vmem:[%s788_s6 + $0x10] sm:$0xff] }
 0x42b   :  { %371 = vmatpush.msrb.mxu0 %v352_v9 }
 0x42c   :  { %v281_v12 = vrot.slane %v280_v11, 1 }
 0x42d   :  { %372 = vmatpush.msrb.mxu0 %v351_v10 }
 0x42e   :  { %v282_v13 = vmax.f32 %v280_v11, %v281_v12  ;;  %v350_v11 = vld [vmem:[%s788_s6] sm:$0xff] }
 0x42f   :  { %373 = vmatpush.msrb.mxu0 %v350_v11 }
 0x430   :  { %v283_v14 = vsub.f32 %v274_v4, %v282_v13 }
 0x432   :  { %v284_v15 = vmul.f32 1.442695, %v283_v14 }
 0x434   :  { %449 = vpow2.f32 %v284_v15 }
 0x43a   :  { %v450_v17 = vpop.eup %449 }
 0x43b   :  { %v286_v18 = vsel %vm275_vm8, %v450_v17, 0.0 }
 0x43c   :  { %v287_v19 = vrot.slane %v286_v18, 4 }
 0x43e   :  { %v288_v20 = vadd.f32 %v287_v19, %v286_v18 }
 0x440   :  { %v289_v21 = vrot.slane %v288_v20, 2 }
 0x442   :  { %v290_v22 = vadd.f32 %v289_v21, %v288_v20 }
 0x444   :  { %v291_v23 = vrot.slane %v290_v22, 1 }
 0x446   :  { %v292_v24 = vadd.f32 %v291_v23, %v290_v22 }
 0x448   :  { %451 = vrcp.f32 %v292_v24  ;;  %v329_v24 = vld [vmem:[%s786_s4 + $0x65] sm:$0x1] }
 0x44e   :  { %v452_v25 = vpop.eup %451 }
 0x44f   :  { %v294_v26 = vmul.f32 %v452_v25, %v450_v17 }
 0x451   :  { %297 = vperm.xlu2 %434, %v294_v26  }
 0x459   :  { %113 = vrot.lane.b32.xlu2 %v110_v27, %s491_s11 }
 0x461   :  { %168 = vrot.lane.b32.xlu2 %v111_v38, %s492_s22  ;;  %v192_v38 = vrot.slane %v580_v33, 6 }
 0x4ab   :  { %v298_v45 = vpop.permute.xlu2 %297 }
 0x4ac   :  { %v300_v47 = vmul.f32 %v298_v45, %v645_v56 }
 0x4ae   :  { %v301_v49 = vsel %vm225_vm7, %v300_v47, 0.0 }
 0x4af   :  { %v302_v50 = vrot.slane %v301_v49, 4 }
 0x4b1   :  { %v303_v52 = vadd.f32 %v302_v50, %v301_v49 }
 0x4b3   :  { %v304_v55 = vrot.slane %v303_v52, 2  ;;  %v114_v56 = vpop.permute.xlu2 %113 }
 0x4b4   :  { %v116_v58 = vsel %vm36_vm0, %v570_v8, %v114_v56  ;;  %vm205_vm0 = vcmask 1042432  }
 0x4b5   :  { %v305_v59 = vadd.f32 %v304_v55, %v303_v52  ;;  %426 = vmatmul.msk.f32.vlgmr.msra.gmra.mxu1 %vm45_vm1, %v116_v58  ;;  %vm211_vm1 = vcmask 257024  }
 0x4b7   :  { %v306_v61 = vrot.slane %v305_v59, 1 }
 0x4b9   :  { %v307_v62 = vadd.f32 %v306_v61, %v305_v59 }
 0x4bb   :  { %309 = vrot.lane.b32.xlu0 %v307_v62, %s493_s27  ;;  %v169_v27 = vpop.permute.xlu2 %168 }
 0x52d   :  { %v310_v8 = vpop.permute.xlu0 %309 }
 0x52e   :  { %v312_v0 = vsel %vm225_vm7, %v635_v53, %v310_v8 }
 0x52f   :  { %346 = vmatmul.f32.vlgmr.msra.gmra.mxu3 %v312_v0 }
 0x532   :  { %v144_v3 = vpop.f32.mrf.mxu1 }
 0x533   :  { %v145_v4 = vadd.f32 %v144_v3, %v123_v1 }
 0x535   :  { %453 = vtanh.f32 %v145_v4  ;;  %v427_v6 = vmul.f32 -1.442695, %v145_v4 }
 0x537   :  { %455 = vpow2.f32 %v427_v6 }
 0x53b   :  { %v454_v5 = vpop.eup %453 }
 0x53c   :  { %173 = vrot.lane.b32.xlu0 %v454_v5, %s493_s27 }
 0x53d   :  { %v456_v7 = vpop.eup %455 }
 0x53e   :  { %v150_v53 = vadd.f32 1.0, %v456_v7 }
 0x540   :  { %457 = vrcp.f32 %v150_v53  ;;  %vm156_vm9 = vweird.f32 %v150_v53  ;;  %v162_v16 = vand.u32 2147483648, %v150_v53  ;;  %v160_v18 = vand.u32 2147483647, %v150_v53 }
 0x542   :  { %v163_v19 = vor.u32 1.1754944e-38, %v162_v16  ;;  %vm161_vm12 = vcmp.eq.f32.partialorder %v160_v18, 8.507059e+37 }
 0x546   :  { %v458_v12 = vpop.eup %457 }
 0x547   :  { %v152_v13 = vmul.f32 %v458_v12, %v150_v53  ;;  %vm157_vm10 = vweird.f32 %v458_v12 }
 0x548   :  { %vm158_vm11 = vmor %vm156_vm9, %vm157_vm10 }
 0x549   :  { %v153_v14 = vsub.f32 1.0, %v152_v13 }
 0x54b   :  { %v154_v15 = vmul.f32 %v458_v12, %v153_v14 }
 0x54d   :  { %v155_v17 = vadd.f32 %v458_v12, %v154_v15 }
 0x54f   :  { %v159_v20 = vsel %vm158_vm11, %v458_v12, %v155_v17 }
 0x550   :  { %v164_v21 = vsel %vm161_vm12, %v163_v19, %v159_v20 }
 0x551   :  { %v171_v28 = vmul.f32 %v169_v27, %v164_v21 }
 0x5ae   :  { %v174_v22 = vpop.permute.xlu0 %173 }
 0x5af   :  { %v176_v23 = vmul.f32 %v174_v22, %v164_v21 }
 0x5b1   :  { %178 = vrot.lane.b32.xlu0 %v176_v23, %s492_s22 }
 0x5b2   :  { %v347_v25 = vpop.f32.mrf.mxu3 }
 0x5b3   :  { %v348_v26 = vadd.f32 %v347_v25, %v329_v24 }
 0x5b5   :  { %428 = vmatmul.msk.f32.vlgmr.msrb.gmra.mxu0 %vm217_vm6, %v348_v26 }
 0x623   :  { %v179_v29 = vpop.permute.xlu0 %178 }
 0x624   :  { %v181_v30 = vadd.f32 %v179_v29, %v171_v28 }
 0x626   :  { %459 = vtanh.f32 %v181_v30  ;;  %v197_v31 = vrot.slane %v181_v30, 5 }
 0x628   :  { %198 = vrot.lane.b32.xlu1 %v197_v31, %s493_s27 }
 0x62c   :  { %v460_v32 = vpop.eup %459 }
 0x62d   :  { %184 = vrot.lane.b32.xlu0 %v460_v32, %s493_s27 }
 0x632   :  { %v375_v35 = vpop.f32.mrf.mxu0 }
 0x633   :  { %v376_v37 = vadd.f32 %v375_v35, %v354_v34 }
 0x635   :  { %193 = vrot.lane.b32.xlu0 %v192_v38, %s493_s27  ;;  %v379_v39 = vsel %vm378_vm13, %v376_v37, -inf }
 0x636   :  { %380 = vmax.xlane.f32.xlu2 %v379_v39 }
 0x69a   :  { %v199_v45 = vpop.permute.xlu1 %198 }
 0x69f   :  { %v185_v40 = vpop.permute.xlu0 %184 }
 0x6a0   :  { %v187_v41 = vmul.f32 %v185_v40, %v164_v21 }
 0x6a2   :  { %v189_v42 = vrot.slane %v187_v41, 7 }
 0x6a4   :  { %v202_v43 = vsel %vm201_vm14, %v584_v36, %v189_v42 }
 0x6a7   :  { %v194_v44 = vpop.permute.xlu0 %193 }
 0x6a8   :  { %v204_v46 = vsel %vm203_vm15, %v202_v43, %v194_v44 }
 0x6a9   :  { %v381_v47 = vpop.xlane.xlu2 %380  ;;  %v206_v48 = vsel %vm205_vm0, %v204_v46, %v199_v45 }
 0x6aa   :  { %v382_v49 = vsub.f32 %v376_v37, %v381_v47  ;;  %208 = vrot.lane.b32.xlu2 %v206_v48, %s492_s22  ;;  %s495_s22 = smov [#allocation2]  }
 0x6ab   :  { %s409_s1 = sshll.u32 %s495_s22, 4  ;;  %s410_s1 = int_to_ptr.vmem [resolvable:$true] %s409_s1 }
 0x6ac   :  { %v383_v33 = vmul.f32 1.442695, %v382_v49 }
 0x6ae   :  { %461 = vpow2.f32 %v383_v33 }
 0x6b4   :  { %v462_v50 = vpop.eup %461 }
 0x6b5   :  { %v385_v51 = vsel %vm378_vm13, %v462_v50, 0.0 }
 0x6b6   :  { %386 = vadd.xlane.f32.xlu0 %v385_v51 }
 0x704   :  { %v209_v52 = vpop.permute.xlu2 %208 }
 0x705   :  { %212 = vst.msk [vmem:[%s790_s8] sm:$0xf] %vm211_vm1, %v209_v52 }
 0x729   :  { %v387_v36 = vpop.xlane.xlu0 %386 }
 0x72a   :  { %463 = vrcp.f32 %v387_v36  ;;  %v399_v57 = vand.u32 2147483648, %v387_v36  ;;  %v397_v59 = vand.u32 2147483647, %v387_v36  ;;  %vm393_vm3 = vweird.f32 %v387_v36 }
 0x72c   :  { %v400_v61 = vor.u32 1.1754944e-38, %v399_v57  ;;  %vm398_vm5 = vcmp.eq.f32.partialorder %v397_v59, 8.507059e+37 }
 0x730   :  { %v464_v54 = vpop.eup %463 }
 0x731   :  { %v389_v55 = vmul.f32 %v464_v54, %v387_v36  ;;  %vm394_vm2 = vweird.f32 %v464_v54 }
 0x732   :  { %vm395_vm4 = vmor %vm393_vm3, %vm394_vm2 }
 0x733   :  { %v390_v56 = vsub.f32 1.0, %v389_v55 }
 0x735   :  { %v391_v58 = vmul.f32 %v464_v54, %v390_v56 }
 0x737   :  { %v392_v60 = vadd.f32 %v464_v54, %v391_v58 }
 0x739   :  { %v396_v62 = vsel %vm395_vm4, %v464_v54, %v392_v60 }
 0x73a   :  { %v401_v63 = vsel %vm398_vm5, %v400_v61, %v396_v62 }
 0x73b   :  { %v402_v8 = vmul.f32 %v462_v50, %v401_v63 }
 0x73d   :  { %403 = vst.msk [vmem:[#allocation2] sm:$0x1] %vm378_vm13, %v402_v8 }
 0x73e   :  { %414 = dma.vmem_to_hbm [thread:$0]  %s410_s1, 16, %s412_s18, [#allocation3]  }
 0x73f   :  { %489 = dma.done.wait [#allocation3], 16  }
 0x740   :  { %490 = vsyncadd [#allocation3], 4294967280 }
 0x741   :  { %423 = vsyncpa [#allocation3], 1 }

</bundles_post_ra>
